<compile_context>
chip_gen: v7x
topology: tpu7x:2x2x1
jax: 0.10.0
libtpu: 0.0.40
codegen_flags: <defaults>
</compile_context>

<pallas_src>
import functools

import jax
import jax.numpy as jnp
from jax.experimental import pallas as pl
from jax.experimental.pallas import tpu as pltpu

_HIDDEN = 256


def _round_up(n, m):
    return ((n + m - 1) // m) * m


def _critic_kernel(x_ref, a_ref, w1x_ref, w1a_ref, b1_ref, w2_ref, b2_ref,
                   w3_ref, b3_ref, o_ref):
    """One batch tile: fused concat-matmul -> ReLU -> matmul -> ReLU -> reduce."""
    mm_dtype = w1x_ref.dtype                         # bf16 (fast path) or f32

    x = x_ref[...].astype(mm_dtype)                  # (TB, state_dim)
    a = a_ref[...].astype(mm_dtype)                  # (TB, action_dim)

    # Layer 1: fused "concat" matmul on the MXU, f32 accumulate, f32 epilogue.
    h1 = (jnp.dot(x, w1x_ref[...], preferred_element_type=jnp.float32)
          + jnp.dot(a, w1a_ref[...], preferred_element_type=jnp.float32)
          + b1_ref[...])
    h1 = jnp.maximum(h1, 0.0)                        # (TB, 256) f32

    # Layer 2.
    h2 = jnp.dot(h1.astype(mm_dtype), w2_ref[...],
                 preferred_element_type=jnp.float32) + b2_ref[...]
    h2 = jnp.maximum(h2, 0.0)                        # (TB, 256) f32

    # Layer 3 (256 -> 1): VPU multiply + cross-lane reduce instead of an N=1
    # MXU matmul; b3 is an SMEM scalar.
    q = jnp.sum(h2 * w3_ref[...], axis=-1, keepdims=True) + b3_ref[0, 0]
    o_ref[...] = q.astype(o_ref.dtype)               # (TB, 1)


@functools.partial(jax.jit, static_argnames=("matmul_dtype", "block_batch"))
def critic_forward(x, a, params, matmul_dtype=jnp.bfloat16, block_batch=None):
    """x: (B, state_dim), a: (B, action_dim) -> (B, 1) float32."""
    x = x.astype(jnp.float32)
    a = a.astype(jnp.float32)
    batch, state_dim = x.shape
    action_dim = a.shape[1]
    hidden = params["w2"].shape[0]

    # Weights for the MXU in matmul_dtype (bf16 halves the resident-weight DMA
    # and doubles MXU throughput); everything elementwise stays f32.
    w1x = params["w1x"].astype(matmul_dtype)
    w1a = params["w1a"].astype(matmul_dtype)
    w2 = params["w2"].astype(matmul_dtype)
    b1 = params["b1"].astype(jnp.float32)
    b2 = params["b2"].astype(jnp.float32)
    w3 = params["w3"].astype(jnp.float32)            # (1, 256) row
    b3 = params["b3"].astype(jnp.float32).reshape(1, 1)

    # Batch tiling: pick a tile, pad batch to a multiple of it.
    tb = 1024 if block_batch is None else block_batch
    tb = min(_round_up(tb, 8), _round_up(batch, 8))
    padded = _round_up(batch, tb)
    if padded != batch:
        pad = padded - batch
        x = jnp.pad(x, ((0, pad), (0, 0)))
        a = jnp.pad(a, ((0, pad), (0, 0)))
    grid = (padded // tb,)

    # Advisory cost estimate for XLA's scheduler.
    w_bytes = jnp.dtype(matmul_dtype).itemsize
    flops = 2 * padded * (state_dim * hidden + action_dim * hidden
                          + hidden * hidden + hidden)
    bytes_accessed = (4 * padded * (state_dim + action_dim + 1)
                      + (state_dim + action_dim + hidden) * hidden * w_bytes
                      + 4 * (2 * hidden + hidden + 1))
    cost = pl.CostEstimate(flops=int(flops), transcendentals=0,
                           bytes_accessed=int(bytes_accessed))

    out = pl.pallas_call(
        _critic_kernel,
        out_shape=jax.ShapeDtypeStruct((padded, 1), jnp.float32),
        grid=grid,
        in_specs=[
            pl.BlockSpec((tb, state_dim), lambda i: (i, 0)),        # x tile
            pl.BlockSpec((tb, action_dim), lambda i: (i, 0)),       # a tile
            pl.BlockSpec((state_dim, hidden), lambda i: (0, 0)),    # w1x (resident)
            pl.BlockSpec((action_dim, hidden), lambda i: (0, 0)),   # w1a (resident)
            pl.BlockSpec((1, hidden), lambda i: (0, 0)),            # b1
            pl.BlockSpec((hidden, hidden), lambda i: (0, 0)),       # w2 (resident)
            pl.BlockSpec((1, hidden), lambda i: (0, 0)),            # b2
            pl.BlockSpec((1, hidden), lambda i: (0, 0)),            # w3 row
            pl.BlockSpec(memory_space=pltpu.MemorySpace.SMEM),      # b3 scalar
        ],
        out_specs=pl.BlockSpec((tb, 1), lambda i: (i, 0)),
        compiler_params=pltpu.CompilerParams(
            dimension_semantics=("parallel",),        # megacore-shard on v7x
            vmem_limit_bytes=32 * 1024 * 1024,        # explicit, fits v5e/v6e/v7x
        ),
        cost_estimate=cost,
    )(x, a, w1x, w1a, b1, w2, b2, w3, b3)

    return out[:batch]


def init_critic_params(key, state_dim, action_dim, hidden=_HIDDEN):
    """Deterministic init matching torch.nn.Linear default U(-1/sqrt(fan_in), +).

    w1 is stored pre-split into w1x/w1a (equivalent to the concat formulation);
    w3 is stored as a (1, hidden) row for the in-kernel lane reduction.
    """
    in_dim = state_dim + action_dim
    keys = jax.random.split(key, 6)

    def linear(kw, kb, fan_in, fan_out):
        bound = 1.0 / jnp.sqrt(fan_in)
        w = jax.random.uniform(kw, (fan_in, fan_out), jnp.float32, -bound, bound)
        b = jax.random.uniform(kb, (1, fan_out), jnp.float32, -bound, bound)
        return w, b

    w1, b1 = linear(keys[0], keys[1], in_dim, hidden)
    w2, b2 = linear(keys[2], keys[3], hidden, hidden)
    bound3 = 1.0 / jnp.sqrt(hidden)
    w3 = jax.random.uniform(keys[4], (1, hidden), jnp.float32, -bound3, bound3)
    b3 = jax.random.uniform(keys[5], (1, 1), jnp.float32, -bound3, bound3)
    return {"w1x": w1[:state_dim], "w1a": w1[state_dim:], "b1": b1,
            "w2": w2, "b2": b2, "w3": w3, "b3": b3}


def _reference_forward(x, a, params):
    """Pure-JAX f32 reference with torch's concat semantics."""
    xa = jnp.concatenate([x, a], axis=1)
    w1 = jnp.concatenate([params["w1x"], params["w1a"]], axis=0)
    h1 = jnp.maximum(xa @ w1 + params["b1"], 0.0)
    h2 = jnp.maximum(h1 @ params["w2"] + params["b2"], 0.0)
    return h2 @ params["w3"].T + params["b3"]


if __name__ == "__main__":
    state_dim, action_dim, batch = 8, 4, 2

    key = jax.random.PRNGKey(0)
    kx, ka, kp = jax.random.split(key, 3)
    x = jax.random.normal(kx, (batch, state_dim), jnp.float32)
    a = jax.random.normal(ka, (batch, action_dim), jnp.float32)
    params = init_critic_params(kp, state_dim, action_dim)

    q_ref = _reference_forward(x, a, params)

    # f32 MXU path: tight match against the reference.
    q32 = critic_forward(x, a, params, matmul_dtype=jnp.float32)
    jax.block_until_ready(q32)
    assert q32.shape == (batch, 1), q32.shape
    assert jnp.allclose(q32, q_ref, atol=1e-3, rtol=1e-3), (q32, q_ref)

    # bf16 MXU path (default fast path): f32 accumulation keeps it close.
    qbf = critic_forward(x, a, params)
    jax.block_until_ready(qbf)
    assert qbf.shape == (batch, 1), qbf.shape
    assert jnp.allclose(qbf, q_ref, atol=5e-2, rtol=5e-2), (qbf, q_ref)

    # Multi-tile grid + batch-padding path (batch not a multiple of the tile).
    kb = jax.random.PRNGKey(1)
    xb = jax.random.normal(jax.random.fold_in(kb, 0), (200, state_dim), jnp.float32)
    ab = jax.random.normal(jax.random.fold_in(kb, 1), (200, action_dim), jnp.float32)
    qb = critic_forward(xb, ab, params, block_batch=64)
    jax.block_until_ready(qb)
    qb_ref = _reference_forward(xb, ab, params)
    assert qb.shape == (200, 1), qb.shape
    assert jnp.allclose(qb, qb_ref, atol=5e-2, rtol=5e-2)

    print("KERNEL_OK")
</pallas_src>

<mosaic_0001>
module attributes {stable_mosaic.version = 11 : i64} {
  func.func @_critic_kernel(%arg0: i32, %arg1: memref<8x8xf32, #tpu.memory_space<vmem>>, %arg2: memref<8x4xf32, #tpu.memory_space<vmem>>, %arg3: memref<8x256xf32, #tpu.memory_space<vmem>>, %arg4: memref<4x256xf32, #tpu.memory_space<vmem>>, %arg5: memref<1x256xf32, #tpu.memory_space<vmem>>, %arg6: memref<256x256xf32, #tpu.memory_space<vmem>>, %arg7: memref<1x256xf32, #tpu.memory_space<vmem>>, %arg8: memref<1x256xf32, #tpu.memory_space<vmem>>, %arg9: memref<1x1xf32, #tpu.memory_space<smem>>, %arg10: memref<8x1xf32, #tpu.memory_space<vmem>>) attributes {dimension_semantics = [#tpu.dimension_semantics<parallel>], iteration_bounds = array<i64: 1>, scalar_prefetch = 0 : i64, scratch_operands = 0 : i64, tpu.core_type = #tpu.core_type<tc>, window_params = [{transform_indices = @transform_0, window_bounds = array<i64: 8, 8>}, {transform_indices = @transform_1, window_bounds = array<i64: 8, 4>}, {pipeline_mode = #tpu.pipeline_mode<synchronous>, transform_indices = @transform_2, window_bounds = array<i64: 8, 256>}, {pipeline_mode = #tpu.pipeline_mode<synchronous>, transform_indices = @transform_3, window_bounds = array<i64: 4, 256>}, {pipeline_mode = #tpu.pipeline_mode<synchronous>, transform_indices = @transform_4, window_bounds = array<i64: 1, 256>}, {pipeline_mode = #tpu.pipeline_mode<synchronous>, transform_indices = @transform_5, window_bounds = array<i64: 256, 256>}, {pipeline_mode = #tpu.pipeline_mode<synchronous>, transform_indices = @transform_6, window_bounds = array<i64: 1, 256>}, {pipeline_mode = #tpu.pipeline_mode<synchronous>, transform_indices = @transform_7, window_bounds = array<i64: 1, 256>}, {transform_indices = @transform_8, window_bounds = array<i64: 1, 1>}, {transform_indices = @transform_9, window_bounds = array<i64: 8, 1>}]} {
    %c0 = arith.constant 0 : index
    %c0_0 = arith.constant 0 : index
    %0 = vector.load %arg1[%c0, %c0_0] : memref<8x8xf32, #tpu.memory_space<vmem>>, vector<8x8xf32>
    %c0_1 = arith.constant 0 : index
    %c0_2 = arith.constant 0 : index
    %1 = vector.load %arg2[%c0_1, %c0_2] : memref<8x4xf32, #tpu.memory_space<vmem>>, vector<8x4xf32>
    %c0_3 = arith.constant 0 : index
    %c0_4 = arith.constant 0 : index
    %2 = vector.load %arg3[%c0_3, %c0_4] : memref<8x256xf32, #tpu.memory_space<vmem>>, vector<8x256xf32>
    %cst = arith.constant dense<0.000000e+00> : vector<8x256xf32>
    %3 = tpu.matmul %0, %2, %cst {dimension_numbers = #tpu.dot_dimension_numbers<[1], [0], [0], [1], [0, 0, 1, 1], [], []>} : vector<8x8xf32>, vector<8x256xf32>, vector<8x256xf32> -> vector<8x256xf32>
    %c0_5 = arith.constant 0 : index
    %c0_6 = arith.constant 0 : index
    %4 = vector.load %arg4[%c0_5, %c0_6] : memref<4x256xf32, #tpu.memory_space<vmem>>, vector<4x256xf32>
    %cst_7 = arith.constant dense<0.000000e+00> : vector<8x256xf32>
    %5 = tpu.matmul %1, %4, %cst_7 {dimension_numbers = #tpu.dot_dimension_numbers<[1], [0], [0], [1], [0, 0, 1, 1], [], []>} : vector<8x4xf32>, vector<4x256xf32>, vector<8x256xf32> -> vector<8x256xf32>
    %6 = arith.addf %3, %5 : vector<8x256xf32>
    %c0_8 = arith.constant 0 : index
    %c0_9 = arith.constant 0 : index
    %7 = vector.load %arg5[%c0_8, %c0_9] : memref<1x256xf32, #tpu.memory_space<vmem>>, vector<1x256xf32>
    %8 = vector.broadcast %7 : vector<1x256xf32> to vector<8x256xf32>
    %9 = arith.addf %6, %8 : vector<8x256xf32>
    %cst_10 = arith.constant 0.000000e+00 : f32
    %10 = vector.broadcast %cst_10 : f32 to vector<8x256xf32>
    %11 = arith.maximumf %9, %10 : vector<8x256xf32>
    %c0_11 = arith.constant 0 : index
    %c0_12 = arith.constant 0 : index
    %12 = vector.load %arg6[%c0_11, %c0_12] : memref<256x256xf32, #tpu.memory_space<vmem>>, vector<256x256xf32>
    %cst_13 = arith.constant dense<0.000000e+00> : vector<8x256xf32>
    %13 = tpu.matmul %11, %12, %cst_13 {dimension_numbers = #tpu.dot_dimension_numbers<[1], [0], [0], [1], [0, 0, 1, 1], [], []>} : vector<8x256xf32>, vector<256x256xf32>, vector<8x256xf32> -> vector<8x256xf32>
    %c0_14 = arith.constant 0 : index
    %c0_15 = arith.constant 0 : index
    %14 = vector.load %arg7[%c0_14, %c0_15] : memref<1x256xf32, #tpu.memory_space<vmem>>, vector<1x256xf32>
    %15 = vector.broadcast %14 : vector<1x256xf32> to vector<8x256xf32>
    %16 = arith.addf %13, %15 : vector<8x256xf32>
    %cst_16 = arith.constant 0.000000e+00 : f32
    %17 = vector.broadcast %cst_16 : f32 to vector<8x256xf32>
    %18 = arith.maximumf %16, %17 : vector<8x256xf32>
    %c0_17 = arith.constant 0 : index
    %c0_18 = arith.constant 0 : index
    %19 = vector.load %arg8[%c0_17, %c0_18] : memref<1x256xf32, #tpu.memory_space<vmem>>, vector<1x256xf32>
    %20 = vector.broadcast %19 : vector<1x256xf32> to vector<8x256xf32>
    %21 = arith.mulf %18, %20 : vector<8x256xf32>
    %cst_19 = arith.constant dense<0.000000e+00> : vector<8xf32>
    %22 = vector.multi_reduction <add>, %21, %cst_19 [1] : vector<8x256xf32> to vector<8xf32>
    %23 = vector.shape_cast %22 : vector<8xf32> to vector<8x1xf32>
    %c0_20 = arith.constant 0 : index
    %c0_21 = arith.constant 0 : index
    %24 = memref.load %arg9[%c0_20, %c0_21] : memref<1x1xf32, #tpu.memory_space<smem>>
    %25 = vector.broadcast %24 : f32 to vector<8x1xf32>
    %26 = arith.addf %23, %25 : vector<8x1xf32>
    %c0_22 = arith.constant 0 : index
    %c0_23 = arith.constant 0 : index
    %27 = vector.load %arg10[%c0_22, %c0_23] : memref<8x1xf32, #tpu.memory_space<vmem>>, vector<8x1xf32>
    tpu.vector_store %arg10[%c0_22, %c0_23], %26 {strides = array<i32>} : memref<8x1xf32, #tpu.memory_space<vmem>>, vector<8x1xf32>,
    return
  }
  func.func @transform_0(%arg0: i32) -> (i32, i32) {
    %c0_i32 = arith.constant 0 : i32
    %c0_i32_0 = arith.constant 0 : i32
    return %arg0, %c0_i32 : i32, i32
  }
  func.func @transform_1(%arg0: i32) -> (i32, i32) {
    %c0_i32 = arith.constant 0 : i32
    %c0_i32_0 = arith.constant 0 : i32
    return %arg0, %c0_i32 : i32, i32
  }
  func.func @transform_2(%arg0: i32) -> (i32, i32) {
    %c0_i32 = arith.constant 0 : i32
    %c0_i32_0 = arith.constant 0 : i32
    %c0_i32_1 = arith.constant 0 : i32
    return %c0_i32, %c0_i32_0 : i32, i32
  }
  func.func @transform_3(%arg0: i32) -> (i32, i32) {
    %c0_i32 = arith.constant 0 : i32
    %c0_i32_0 = arith.constant 0 : i32
    %c0_i32_1 = arith.constant 0 : i32
    return %c0_i32, %c0_i32_0 : i32, i32
  }
  func.func @transform_4(%arg0: i32) -> (i32, i32) {
    %c0_i32 = arith.constant 0 : i32
    %c0_i32_0 = arith.constant 0 : i32
    %c0_i32_1 = arith.constant 0 : i32
    return %c0_i32, %c0_i32_0 : i32, i32
  }
  func.func @transform_5(%arg0: i32) -> (i32, i32) {
    %c0_i32 = arith.constant 0 : i32
    %c0_i32_0 = arith.constant 0 : i32
    %c0_i32_1 = arith.constant 0 : i32
    return %c0_i32, %c0_i32_0 : i32, i32
  }
  func.func @transform_6(%arg0: i32) -> (i32, i32) {
    %c0_i32 = arith.constant 0 : i32
    %c0_i32_0 = arith.constant 0 : i32
    %c0_i32_1 = arith.constant 0 : i32
    return %c0_i32, %c0_i32_0 : i32, i32
  }
  func.func @transform_7(%arg0: i32) -> (i32, i32) {
    %c0_i32 = arith.constant 0 : i32
    %c0_i32_0 = arith.constant 0 : i32
    %c0_i32_1 = arith.constant 0 : i32
    return %c0_i32, %c0_i32_0 : i32, i32
  }
  func.func @transform_8(%arg0: i32) -> (i32, i32) {
    %c0_i32 = arith.constant 0 : i32
    %c0_i32_0 = arith.constant 0 : i32
    %c0_i32_1 = arith.constant 0 : i32
    return %c0_i32, %c0_i32_0 : i32, i32
  }
  func.func @transform_9(%arg0: i32) -> (i32, i32) {
    %c0_i32 = arith.constant 0 : i32
    %c0_i32_0 = arith.constant 0 : i32
    return %arg0, %c0_i32 : i32, i32
  }
}

</mosaic_0001>

<bundles_post_ra>
// kernel: critic_forward.1
= control target key start
LH: loop header
LB: loop body
LE: loop exit
PB: predicated region body
PF: predicated region fallthrough
CT: control target
= control target key end

     0   :  { %15 = vsyncpa [#allocation4], 0  ;;  %s500_s30 = smov [#allocation3]   ;;  %s596_s0 = inlined_call_operand.vmem [shape: f32[8,8], index: 0, kind: input, shape index: {}]   ;;  %s597_s1 = inlined_call_operand.vmem [shape: f32[8,4], index: 1, kind: input, shape index: {}]   ;;  %s598_s2 = inlined_call_operand.vmem [shape: f32[8,256], index: 2, kind: input, shape index: {}]   ;;  %s599_s3 = inlined_call_operand.vmem [shape: f32[4,256], index: 3, kind: input, shape index: {}]   ;;  %s600_s4 = inlined_call_operand.vmem [shape: f32[1,256], index: 4, kind: input, shape index: {}]   ;;  %s601_s5 = inlined_call_operand.hbm [shape: f32[256,256], index: 5, kind: input, shape index: {}]   ;;  %s602_s6 = inlined_call_operand.vmem [shape: f32[1,256], index: 6, kind: input, shape index: {}]   ;;  %s603_s7 = inlined_call_operand.vmem [shape: f32[1,256], index: 7, kind: input, shape index: {}]   ;;  %s604_s8 = inlined_call_operand.<no memory space> [shape: f32[1,1], index: 8, kind: input, shape index: {}]   ;;  %s605_s9 = inlined_call_operand.vmem [shape: f32[8,1], index: 9, kind: output, shape index: {}]  }
   0x1   :  { %s31_s10 = sshll.u32 %s500_s30, 4  ;;  %s476_s13 = scalar_lea.hbm %s601_s5, 8192  ;;  %s32_s10 = int_to_ptr.vmem [resolvable:$true] %s31_s10 }
   0x2   :  { %p477_p0 = scmp.ne.s32.totalorder %s601_s5, %s476_s13  ;;  %p480_p1 = scmp.lt.u32.totalorder %s476_s13, %s601_s5 }
   0x4   :  { %p482_p2 = pnand %p480_p1, %p477_p0 }
   0x6   :  { %485 = shalt.err (!%p482_p2)
}
   0x7   :  { %s486_s18 = scalar_lea.vmem %s32_s10, 8192  ;;  %p491_p4 = scmp.lt.s32.totalorder %s32_s10, %s32_s10 }
   0x8   :  { %p487_p3 = scmp.ne.s32.totalorder %s32_s10, %s486_s18  ;;  %p492_p5 = scmp.lt.s32.totalorder %s486_s18, %s486_s18 }
   0xa   :  { %p493_p6 = por %p492_p5, %p491_p4 }
   0xc   :  { %p494_p7 = pnand %p493_p6, %p487_p3 }
   0xe   :  { %497 = shalt.err (!%p494_p7)
}
   0xf   :  { %s501_s19 = smov 256   ;;  %s502_s20 = smov 16  }
  0x10   :  { %37 = dma.hbm_to_vmem [thread:$0]  %s601_s5, 8192, %s32_s10, [#allocation4], %s501_s19, %s501_s19, %s502_s20  }
  0x11   :  { %498 = dma.done.wait [#allocation4], 8192  }
  0x12   :  { %499 = vsyncadd [#allocation4], 4294959104  ;;  %v503_v0 = vmov 0.0   ;;  %v51_v1 = vld [vmem:[%s599_s3] sm:$0xff]  ;;  %vm58_vm0 = vcmask 1043456   ;;  %v50_v4 = vld [vmem:[%s598_s2 + $0x8] sm:$0xff] }
  0x13   :  { %127 = vmatprep.mubr.f32.mxu0 %v503_v0  ;;  %v53_v2 = vcombine.high %v51_v1, %v51_v1  ;;  %v48_v3 = vld [vmem:[%s597_s1] sm:$0xff]  ;;  %v226_v5 = vld [vmem:[#allocation3 + $0x8] sm:$0xff]  ;;  %vm54_vm1 = vcmask 31744   ;;  %v228_v6 = vld [vmem:[#allocation3 + $0x18] sm:$0xff]  ;;  %vm134_vm2 = vcmask 64512   ;;  %vm394_vm3 = vcmask 7168  }
  0x14   :  { %v225_v7 = vld [vmem:[#allocation3] sm:$0xff]  ;;  %v227_v8 = vld [vmem:[#allocation3 + $0x10] sm:$0xff]  ;;  %v405_v10 = vpack.c.bf16 %v228_v6, %v226_v5  ;;  %v230_v11 = vld [vmem:[#allocation3 + $0x28] sm:$0xff] }
  0x15   :  { %401 = vmatprep.subr.msk.mxu0 %vm58_vm0, %v53_v2  ;;  %v49_v9 = vld [vmem:[%s598_s2] sm:$0xff]  ;;  %v232_v12 = vld [vmem:[#allocation3 + $0x38] sm:$0xff]  ;;  %v407_v13 = vpack.c.bf16 %v227_v8, %v225_v7  ;;  %v231_v16 = vld [vmem:[#allocation3 + $0x30] sm:$0xff] }
  0x16   :  { %402 = vmatpush1.msk.msra.mxu0 %vm58_vm0, %v51_v1  ;;  %v409_v14 = vpack.c.bf16 %v232_v12, %v230_v11  ;;  %v229_v15 = vld [vmem:[#allocation3 + $0x20] sm:$0xff]  ;;  %v234_v17 = vld [vmem:[#allocation3 + $0x48] sm:$0xff]  ;;  %v236_v18 = vld [vmem:[#allocation3 + $0x58] sm:$0xff]  ;;  %406 = vmatprep.subr.bf16.mxu1 %v405_v10 }
  0x17   :  { %403 = vmatmul.mubr.msk.f32.vlgmr.msra.gmra.mrb[0].mxu0 %vm54_vm1, %v48_v3  ;;  %138 = vmatprep.subr.mxu0 %v50_v4  ;;  %v411_v19 = vpack.c.bf16 %v231_v16, %v229_v15  ;;  %v413_v20 = vpack.c.bf16 %v236_v18, %v234_v17  ;;  %v233_v21 = vld [vmem:[#allocation3 + $0x40] sm:$0xff]  ;;  %v235_v22 = vld [vmem:[#allocation3 + $0x50] sm:$0xff]  ;;  %v238_v24 = vld [vmem:[#allocation3 + $0x68] sm:$0xff] }
  0x18   :  { %139 = vmatpush1.msra.mxu0 %v49_v9  ;;  %202 = vmatprep.mubr.f32.mxu0 %v503_v0  ;;  %v47_v23 = vld [vmem:[%s596_s0] sm:$0xff]  ;;  %v240_v25 = vld [vmem:[#allocation3 + $0x78] sm:$0xff]  ;;  %v415_v26 = vpack.c.bf16 %v235_v22, %v233_v21  ;;  %v239_v29 = vld [vmem:[#allocation3 + $0x70] sm:$0xff] }
  0x19   :  { %408 = vmatpush1.bf16.msra.mxu1 %v407_v13  ;;  %v417_v27 = vpack.c.bf16 %v240_v25, %v238_v24  ;;  %v237_v28 = vld [vmem:[#allocation3 + $0x60] sm:$0xff]  ;;  %v242_v30 = vld [vmem:[#allocation3 + $0x88] sm:$0xff]  ;;  %v244_v31 = vld [vmem:[#allocation3 + $0x98] sm:$0xff] }
  0x1a   :  { %410 = vmatprep.subr.bf16.mxu1 %v409_v14  ;;  %v419_v32 = vpack.c.bf16 %v239_v29, %v237_v28  ;;  %v421_v33 = vpack.c.bf16 %v244_v31, %v242_v30  ;;  %v241_v34 = vld [vmem:[#allocation3 + $0x80] sm:$0xff]  ;;  %v243_v35 = vld [vmem:[#allocation3 + $0x90] sm:$0xff]  ;;  %v246_v36 = vld [vmem:[#allocation3 + $0xa8] sm:$0xff] }
  0x1b   :  { %v248_v37 = vld [vmem:[#allocation3 + $0xb8] sm:$0xff]  ;;  %v423_v38 = vpack.c.bf16 %v243_v35, %v241_v34  ;;  %v245_v40 = vld [vmem:[#allocation3 + $0xa0] sm:$0xff]  ;;  %v247_v41 = vld [vmem:[#allocation3 + $0xb0] sm:$0xff] }
  0x1c   :  { %v425_v39 = vpack.c.bf16 %v248_v37, %v246_v36  ;;  %v250_v42 = vld [vmem:[#allocation3 + $0xc8] sm:$0xff]  ;;  %v252_v43 = vld [vmem:[#allocation3 + $0xd8] sm:$0xff]  ;;  %v427_v44 = vpack.c.bf16 %v247_v41, %v245_v40  ;;  %v249_v46 = vld [vmem:[#allocation3 + $0xc0] sm:$0xff] }
  0x1d   :  { %412 = vmatpush1.bf16.msra.mxu1 %v411_v19  ;;  %v429_v45 = vpack.c.bf16 %v252_v43, %v250_v42  ;;  %v251_v47 = vld [vmem:[#allocation3 + $0xd0] sm:$0xff]  ;;  %v254_v48 = vld [vmem:[#allocation3 + $0xe8] sm:$0xff]  ;;  %v256_v49 = vld [vmem:[#allocation3 + $0xf8] sm:$0xff] }
  0x1e   :  { %414 = vmatprep.subr.bf16.mxu1 %v413_v20  ;;  %v431_v50 = vpack.c.bf16 %v251_v47, %v249_v46  ;;  %v433_v51 = vpack.c.bf16 %v256_v49, %v254_v48  ;;  %v253_v52 = vld [vmem:[#allocation3 + $0xe0] sm:$0xff]  ;;  %v255_v53 = vld [vmem:[#allocation3 + $0xf0] sm:$0xff]  ;;  %v258_v54 = vld [vmem:[#allocation3 + $0x108] sm:$0xff] }
  0x1f   :  { %404 = vmatmul.mubr.msk.f32.vlgmr.msra.gmra.mrb[0].mxu0 %vm134_vm2, %v47_v23  ;;  %v260_v55 = vld [vmem:[#allocation3 + $0x118] sm:$0xff]  ;;  %v435_v56 = vpack.c.bf16 %v255_v53, %v253_v52  ;;  %v257_v58 = vld [vmem:[#allocation3 + $0x100] sm:$0xff]  ;;  %v259_v59 = vld [vmem:[#allocation3 + $0x110] sm:$0xff] }
  0x20   :  { %v437_v57 = vpack.c.bf16 %v260_v55, %v258_v54  ;;  %v262_v60 = vld [vmem:[#allocation3 + $0x128] sm:$0xff]  ;;  %v264_v61 = vld [vmem:[#allocation3 + $0x138] sm:$0xff]  ;;  %v439_v62 = vpack.c.bf16 %v259_v59, %v257_v58  ;;  %v261_v0 = vld [vmem:[#allocation3 + $0x120] sm:$0xff] }
  0x21   :  { %416 = vmatpush1.bf16.msra.mxu1 %v415_v26  ;;  %v441_v63 = vpack.c.bf16 %v264_v61, %v262_v60  ;;  %v263_v1 = vld [vmem:[#allocation3 + $0x130] sm:$0xff]  ;;  %v266_v2 = vld [vmem:[#allocation3 + $0x148] sm:$0xff]  ;;  %v268_v3 = vld [vmem:[#allocation3 + $0x158] sm:$0xff] }
  0x22   :  { %418 = vmatprep.subr.bf16.mxu1 %v417_v27  ;;  %v443_v4 = vpack.c.bf16 %v263_v1, %v261_v0  ;;  %v445_v5 = vpack.c.bf16 %v268_v3, %v266_v2  ;;  %v265_v6 = vld [vmem:[#allocation3 + $0x140] sm:$0xff]  ;;  %v267_v7 = vld [vmem:[#allocation3 + $0x150] sm:$0xff]  ;;  %v270_v8 = vld [vmem:[#allocation3 + $0x168] sm:$0xff]  ;;  %v392_v3 = vstv %s604_s8 }
  0x23   :  { %v272_v9 = vld [vmem:[#allocation3 + $0x178] sm:$0xff]  ;;  %v447_v10 = vpack.c.bf16 %v267_v7, %v265_v6  ;;  %v269_v12 = vld [vmem:[#allocation3 + $0x160] sm:$0xff]  ;;  %v271_v13 = vld [vmem:[#allocation3 + $0x170] sm:$0xff] }
  0x24   :  { %v449_v11 = vpack.c.bf16 %v272_v9, %v270_v8  ;;  %v274_v14 = vld [vmem:[#allocation3 + $0x188] sm:$0xff]  ;;  %v276_v15 = vld [vmem:[#allocation3 + $0x198] sm:$0xff]  ;;  %v451_v16 = vpack.c.bf16 %v271_v13, %v269_v12  ;;  %v273_v18 = vld [vmem:[#allocation3 + $0x180] sm:$0xff] }
  0x25   :  { %420 = vmatpush1.bf16.msra.mxu1 %v419_v32  ;;  %v453_v17 = vpack.c.bf16 %v276_v15, %v274_v14  ;;  %v275_v19 = vld [vmem:[#allocation3 + $0x190] sm:$0xff]  ;;  %v278_v20 = vld [vmem:[#allocation3 + $0x1a8] sm:$0xff]  ;;  %v280_v21 = vld [vmem:[#allocation3 + $0x1b8] sm:$0xff] }
  0x26   :  { %422 = vmatprep.subr.bf16.mxu1 %v421_v33  ;;  %v455_v22 = vpack.c.bf16 %v275_v19, %v273_v18  ;;  %v457_v23 = vpack.c.bf16 %v280_v21, %v278_v20  ;;  %v277_v24 = vld [vmem:[#allocation3 + $0x1a0] sm:$0xff]  ;;  %v279_v25 = vld [vmem:[#allocation3 + $0x1b0] sm:$0xff]  ;;  %v282_v26 = vld [vmem:[#allocation3 + $0x1c8] sm:$0xff] }
  0x27   :  { %v284_v27 = vld [vmem:[#allocation3 + $0x1d8] sm:$0xff]  ;;  %v459_v28 = vpack.c.bf16 %v279_v25, %v277_v24  ;;  %v281_v30 = vld [vmem:[#allocation3 + $0x1c0] sm:$0xff]  ;;  %v283_v31 = vld [vmem:[#allocation3 + $0x1d0] sm:$0xff] }
  0x28   :  { %v461_v29 = vpack.c.bf16 %v284_v27, %v282_v26  ;;  %v463_v32 = vpack.c.bf16 %v283_v31, %v281_v30  ;;  %v286_v33 = vld [vmem:[#allocation3 + $0x1e8] sm:$0xff]  ;;  %v288_v34 = vld [vmem:[#allocation3 + $0x1f8] sm:$0xff]  ;;  %v285_v36 = vld [vmem:[#allocation3 + $0x1e0] sm:$0xff] }
  0x29   :  { %424 = vmatpush1.bf16.msra.mxu1 %v423_v38  ;;  %v465_v35 = vpack.c.bf16 %v288_v34, %v286_v33  ;;  %v287_v37 = vld [vmem:[#allocation3 + $0x1f0] sm:$0xff]  ;;  %v209_v42 = vld [vmem:[%s600_s4] sm:$0x3] }
  0x2a   :  { %426 = vmatprep.subr.bf16.mxu1 %v425_v39  ;;  %v467_v38 = vpack.c.bf16 %v287_v37, %v285_v36  ;;  %v211_v39 = vlaneseq  ;;  %v289_v52 = vld [vmem:[%s602_s6] sm:$0x3] }
  0x2b   :  { %v374_v55 = vld [vmem:[%s603_s7] sm:$0x3] }
  0x2c   :  { %v212_v40 = vshrl.u32 %v211_v39, 7 }
  0x2d   :  { %428 = vmatpush1.bf16.msra.mxu1 %v427_v44 }
  0x2e   :  { %430 = vmatprep.subr.bf16.mxu1 %v429_v45  ;;  %v213_v41 = vsub.s32 0, %v212_v40  ;;  %v217_v43 = vsub.s32 1, %v212_v40 }
  0x30   :  { %v214_v44 = vrot.slane %v209_v42, %v213_v41  ;;  %v218_v45 = vrot.slane %v209_v42, %v217_v43  ;;  %v294_v53 = vrot.slane %v289_v52, %v213_v41  ;;  %v298_v54 = vrot.slane %v289_v52, %v217_v43 }
  0x31   :  { %432 = vmatpush1.bf16.msra.mxu1 %v431_v50  ;;  %v379_v59 = vrot.slane %v374_v55, %v213_v41  ;;  %v383_v61 = vrot.slane %v374_v55, %v217_v43 }
  0x32   :  { %434 = vmatprep.subr.bf16.mxu1 %v433_v51 }
  0x35   :  { %436 = vmatpush1.bf16.msra.mxu1 %v435_v56 }
  0x36   :  { %438 = vmatprep.subr.bf16.mxu1 %v437_v57 }
  0x39   :  { %440 = vmatpush1.bf16.msra.mxu1 %v439_v62 }
  0x3a   :  { %442 = vmatprep.subr.bf16.mxu1 %v441_v63 }
  0x3d   :  { %444 = vmatpush1.bf16.msra.mxu1 %v443_v4 }
  0x3e   :  { %446 = vmatprep.subr.bf16.mxu1 %v445_v5 }
  0x41   :  { %448 = vmatpush1.bf16.msra.mxu1 %v447_v10 }
  0x42   :  { %450 = vmatprep.subr.bf16.mxu1 %v449_v11 }
  0x45   :  { %452 = vmatpush1.bf16.msra.mxu1 %v451_v16 }
  0x46   :  { %454 = vmatprep.subr.bf16.mxu1 %v453_v17 }
  0x49   :  { %456 = vmatpush1.bf16.msra.mxu1 %v455_v22 }
  0x4a   :  { %458 = vmatprep.subr.bf16.mxu1 %v457_v23 }
  0x4d   :  { %460 = vmatpush1.bf16.msra.mxu1 %v459_v28 }
  0x4e   :  { %462 = vmatprep.subr.bf16.mxu1 %v461_v29 }
  0x51   :  { %464 = vmatpush1.bf16.msra.mxu1 %v463_v32 }
  0x52   :  { %466 = vmatprep.subr.bf16.mxu1 %v465_v35 }
  0x55   :  { %468 = vmatpush1.bf16.msra.mxu1 %v467_v38 }
  0xf2   :  { %v204_v46 = vpop.f32.mrb[0].mxu0 }
  0xf3   :  { %v221_v47 = vadd.f32 %v214_v44, %v204_v46  ;;  %v206_v48 = vpop.f32.mrb[1].mxu0 }
  0xf4   :  { %v222_v49 = vadd.f32 %v218_v45, %v206_v48 }
  0xf5   :  { %v223_v51 = vmax.f32 %v221_v47, 0.0 }
  0xf6   :  { %v224_v50 = vmax.f32 %v222_v49, 0.0 }
  0xf8   :  { %365 = vmatprep.mubr.f32.mxu1 %v224_v50 }
  0xf9   :  { %366 = vmatmul.mubr.f32.vlgmr.msra.gmra.mrb[0].mxu1 %v223_v51 }
 0x1cc   :  { %v367_v56 = vpop.f32.mrb[0].mxu1 }
 0x1cd   :  { %v368_v57 = vadd.f32 %v367_v56, %v294_v53  ;;  %v369_v58 = vpop.f32.mrb[1].mxu1 }
 0x1ce   :  { %v370_v60 = vadd.f32 %v369_v58, %v298_v54 }
 0x1cf   :  { %v372_v62 = vmax.f32 %v368_v57, 0.0 }
 0x1d0   :  { %v373_v63 = vmax.f32 %v370_v60, 0.0 }
 0x1d1   :  { %v386_v0 = vmul.f32 %v379_v59, %v372_v62 }
 0x1d2   :  { %v387_v1 = vmul.f32 %v383_v61, %v373_v63 }
 0x1d4   :  { %v388_v2 = vadd.f32 %v387_v1, %v386_v0 }
 0x1d6   :  { %389 = vadd.xlane.f32.xlu0 %v388_v2 }
 0x263   :  { %v390_v4 = vpop.xlane.xlu0 %389 }
 0x264   :  { %v393_v5 = vadd.f32 %v392_v3, %v390_v4 }
 0x266   :  { %395 = vst.msk [vmem:[%s605_s9] sm:$0xff] %vm394_vm3, %v393_v5 }
 0x267   :  { %400 = vsyncpa [#allocation4], 1 }

</bundles_post_ra>
